<compile_context>
chip_gen: v7x
topology: tpu7x:2x2x1
jax: 0.10.0
libtpu: 0.0.40
codegen_flags: <defaults>
</compile_context>

<pallas_src>
import functools

import numpy as np
import jax
import jax.numpy as jnp
from jax import lax
from jax.experimental import pallas as pl
from jax.experimental.pallas import tpu as pltpu


def gprgnn_kernel(temp_ref, e_ref, x_ref, w_ref, mavg_ref, pgb_ref, o_ref,
                  *, K, neg_slope, eps):
    """Fused GPRGNN forward on one lane-dense column tile.

    x_ref / o_ref : (N, C) tile, C = (#batches in tile) * T * D, node-major.
    w_ref         : (C, C) bf16 block-diagonal kron(I, W @ (I - 11^T/D)).
    mavg_ref      : (C, C) bf16 block-diagonal kron(I, 11^T/D) (variance only).
    pgb_ref       : (8, C) f32; row0 = centered bias, row1 = gamma, row2 = beta.
    temp_ref      : (K+1,) GPR coefficients in SMEM (learnable).
    """
    # ---- A_hat = softmax(LeakyReLU(E @ E.T, 0.2), -1) + I  (tiny, fused) ----
    e = e_ref[...]                                              # (N, D)
    s = lax.dot_general(e, e, (((1,), (1,)), ((), ())),
                        preferred_element_type=jnp.float32)     # (N, N), no E.T copy
    s = jnp.where(s > 0, s, neg_slope * s)                      # LeakyReLU(0.2)
    s = s - jnp.max(s, axis=-1, keepdims=True)                  # stable softmax
    p = jnp.exp(s)
    p = p / jnp.sum(p, axis=-1, keepdims=True)                  # exact normalization

    n = e_ref.shape[0]
    row = lax.broadcasted_iota(jnp.int32, (n, n), 0)
    col = lax.broadcasted_iota(jnp.int32, (n, n), 1)
    eye = (row == col).astype(jnp.float32)
    a_hat = p + eye

    # ---- M = sum_k temp[k] * A_hat^k  (K tiny (N,N) matmuls, f32 exact) ----
    m = temp_ref[0] * eye
    cur = eye
    for k in range(K):
        cur = jnp.dot(a_hat, cur, preferred_element_type=jnp.float32)
        m = m + temp_ref[k + 1] * cur

    # ---- Linear (mean-centering folded into W) + LayerNorm on (N, C) -------
    # TODO(synk): FC class is not provided in the source; implemented here as
    # Linear(d_model, d_model, bias=True) followed by LayerNorm(d_model).
    x = x_ref[...]                                              # (N, C) == residual
    d = jnp.dot(x.astype(jnp.bfloat16), w_ref[...],
                preferred_element_type=jnp.float32) + pgb_ref[0:1, :]
    var = jnp.dot((d * d).astype(jnp.bfloat16), mavg_ref[...],
                  preferred_element_type=jnp.float32)
    h = d * lax.rsqrt(var + eps) * pgb_ref[1:2, :] + pgb_ref[2:3, :]

    # ---- single wide propagation matmul + epilogue --------------------------
    out = jnp.dot(m.astype(jnp.bfloat16), h.astype(jnp.bfloat16),
                  preferred_element_type=jnp.float32)
    o_ref[...] = jnp.maximum(out, 0.0) + x                      # relu + residual


def _pick_col_tile(B, TD, total_cols):
    """Generation-aware column-tile width (always a whole number of batches)."""
    try:
        kind = jax.devices()[0].device_kind.lower()
    except Exception:  # pragma: no cover - safety net
        kind = ""
    wide_single_core = "v6" in kind   # single TC, 256-deep MXU -> fewer, wider tiles
    if TD % 128 == 0:
        if wide_single_core and total_cols <= 2048:
            return total_cols         # one tile: halves grid steps, fills 256-deep MXU
        return TD                     # one batch per tile -> >=2 parallel tiles (v5e/v7x)
    # Fallback (TD not a multiple of 128): tile by whole batches so the
    # block-diagonal weights stay valid, keeping >=2 tiles where possible so
    # both v7x TensorCores get a parallel grid point.
    bpt = max(1, B // 2)
    while B % bpt:
        bpt -= 1
    return bpt * TD


def gprgnn_forward(x, E, W, bias, gamma, beta, temp):
    B, N, T, D = x.shape
    K = int(temp.shape[0]) - 1
    TD = T * D
    total_cols = B * TD

    # Node-major, lane-dense layout: rows = nodes, columns = (batch, time, dim).
    x2 = jnp.transpose(x, (1, 0, 2, 3)).reshape(N, total_cols)

    col_tile = _pick_col_tile(B, TD, total_cols)
    n_tiles = total_cols // col_tile
    reps = col_tile // D                     # number of D-sized feature blocks / tile

    # Fold LayerNorm mean-centering into the Linear:
    #   d = (x @ W + b) - mean_D(...) = x @ (W @ (I - 11^T/D)) + (b - mean(b))
    center = jnp.eye(D, dtype=jnp.float32) - jnp.full((D, D), 1.0 / D, jnp.float32)
    w_c = W.astype(jnp.float32) @ center
    b_c = jnp.reshape(bias, (D,)) - jnp.mean(bias)

    eye_r = jnp.eye(reps, dtype=jnp.float32)
    w_blk = jnp.kron(eye_r, w_c).astype(jnp.bfloat16)                            # (C, C)
    m_avg = jnp.kron(eye_r, jnp.full((D, D), 1.0 / D, jnp.float32)).astype(jnp.bfloat16)

    # bias / gamma / beta packed into one (8, C) VMEM operand (rows 0..2 used).
    pgb = jnp.zeros((8, col_tile), jnp.float32)
    pgb = pgb.at[0].set(jnp.tile(b_c, reps))
    pgb = pgb.at[1].set(jnp.tile(jnp.reshape(gamma, (D,)), reps))
    pgb = pgb.at[2].set(jnp.tile(jnp.reshape(beta, (D,)), reps))

    kernel = functools.partial(gprgnn_kernel, K=K, neg_slope=0.2, eps=1e-5)
    out2 = pl.pallas_call(
        kernel,
        out_shape=jax.ShapeDtypeStruct((N, total_cols), jnp.float32),
        grid=(n_tiles,),
        in_specs=[
            pl.BlockSpec(memory_space=pltpu.MemorySpace.SMEM),      # temp (K+1,)
            pl.BlockSpec((N, D), lambda j: (0, 0)),                 # E
            pl.BlockSpec((N, col_tile), lambda j: (0, j)),          # x column tile
            pl.BlockSpec((col_tile, col_tile), lambda j: (0, 0)),   # kron(I, W') bf16
            pl.BlockSpec((col_tile, col_tile), lambda j: (0, 0)),   # kron(I, 1/D) bf16
            pl.BlockSpec((8, col_tile), lambda j: (0, 0)),          # bias/gamma/beta
        ],
        out_specs=pl.BlockSpec((N, col_tile), lambda j: (0, j)),
        compiler_params=pltpu.CompilerParams(
            dimension_semantics=("parallel",)),
    )(temp, E, x2, w_blk, m_avg, pgb)

    return jnp.transpose(out2.reshape(N, B, T, D), (1, 0, 2, 3))


def _reference(x, E, W, bias, gamma, beta, temp):
    """Pure-JAX reference mirroring the PyTorch module's forward."""
    B, N, T, D = x.shape
    s = E @ E.T
    s = jnp.where(s > 0, s, 0.2 * s)
    A = jax.nn.softmax(s, axis=-1) + jnp.eye(N, dtype=jnp.float32)
    h = x @ W + jnp.reshape(bias, (D,))
    mu = jnp.mean(h, axis=-1, keepdims=True)
    var = jnp.mean(jnp.square(h - mu), axis=-1, keepdims=True)
    h = (h - mu) / jnp.sqrt(var + 1e-5) * jnp.reshape(gamma, (D,)) + jnp.reshape(beta, (D,))
    hf = h.reshape(B, N, T * D)
    out = temp[0] * hf
    cur = hf
    for k in range(temp.shape[0] - 1):
        cur = jnp.einsum("mn,bnf->bmf", A, cur)
        out = out + temp[k + 1] * cur
    return jnp.maximum(out.reshape(B, N, T, D), 0.0) + x


if __name__ == "__main__":
    # x: (batch, num_of_vertices, num_timesteps, d_model)
    B, N, T, D, K = 2, 8, 4, 32, 3
    alpha = 0.1

    key = jax.random.PRNGKey(0)
    kx, ke, kw, kb = jax.random.split(key, 4)

    x = jax.random.normal(kx, (B, N, T, D), dtype=jnp.float32)

    # E: xavier_uniform_(gain=sqrt(2)) -> U(-b, b), b = gain*sqrt(6/(fan_in+fan_out))
    bound_e = float(np.sqrt(2.0) * np.sqrt(6.0 / (N + D)))
    E = jax.random.uniform(ke, (N, D), jnp.float32, -bound_e, bound_e)

    # Linear(d_model, d_model) default init: U(-1/sqrt(D), 1/sqrt(D))
    bound_w = float(1.0 / np.sqrt(D))
    W = jax.random.uniform(kw, (D, D), jnp.float32, -bound_w, bound_w)
    bias = jax.random.uniform(kb, (1, D), jnp.float32, -bound_w, bound_w)

    gamma = jnp.ones((1, D), jnp.float32)   # LayerNorm weight
    beta = jnp.zeros((1, D), jnp.float32)   # LayerNorm bias

    # temp after GPR_prop.reset_parameters() (learnable -> passed as an input)
    temp_np = np.array([alpha * (1.0 - alpha) ** k for k in range(K + 1)], np.float32)
    temp_np[K] = (1.0 - alpha) ** K
    temp = jnp.asarray(temp_np)

    out = gprgnn_forward(x, E, W, bias, gamma, beta, temp)
    jax.block_until_ready(out)
    assert out.shape == (B, N, T, D)

    with jax.default_matmul_precision("highest"):
        ref = _reference(x, E, W, bias, gamma, beta, temp)
    np.testing.assert_allclose(np.asarray(out), np.asarray(ref), rtol=5e-2, atol=5e-2)

    print("KERNEL_OK")
</pallas_src>

<mosaic_0001>
module attributes {stable_mosaic.version = 11 : i64} {
  func.func @gprgnn_kernel(%arg0: i32, %arg1: memref<4xf32, #tpu.memory_space<smem>>, %arg2: memref<8x32xf32, #tpu.memory_space<vmem>>, %arg3: memref<8x128xf32, #tpu.memory_space<vmem>>, %arg4: memref<128x128xbf16, #tpu.memory_space<vmem>>, %arg5: memref<128x128xbf16, #tpu.memory_space<vmem>>, %arg6: memref<8x128xf32, #tpu.memory_space<vmem>>, %arg7: memref<8x128xf32, #tpu.memory_space<vmem>>) attributes {dimension_semantics = [#tpu.dimension_semantics<parallel>], iteration_bounds = array<i64: 2>, scalar_prefetch = 0 : i64, scratch_operands = 0 : i64, tpu.core_type = #tpu.core_type<tc>, window_params = [{transform_indices = @transform_0, window_bounds = array<i64: 4>}, {pipeline_mode = #tpu.pipeline_mode<synchronous>, transform_indices = @transform_1, window_bounds = array<i64: 8, 32>}, {transform_indices = @transform_2, window_bounds = array<i64: 8, 128>}, {pipeline_mode = #tpu.pipeline_mode<synchronous>, transform_indices = @transform_3, window_bounds = array<i64: 128, 128>}, {pipeline_mode = #tpu.pipeline_mode<synchronous>, transform_indices = @transform_4, window_bounds = array<i64: 128, 128>}, {pipeline_mode = #tpu.pipeline_mode<synchronous>, transform_indices = @transform_5, window_bounds = array<i64: 8, 128>}, {transform_indices = @transform_6, window_bounds = array<i64: 8, 128>}]} {
    %c0 = arith.constant 0 : index
    %c0_0 = arith.constant 0 : index
    %0 = vector.load %arg2[%c0, %c0_0] : memref<8x32xf32, #tpu.memory_space<vmem>>, vector<8x32xf32>
    %cst = arith.constant dense<0.000000e+00> : vector<8x8xf32>
    %1 = tpu.matmul %0, %0, %cst {dimension_numbers = #tpu.dot_dimension_numbers<[1], [1], [0], [0], [0, 0, 1, 0], [], []>} : vector<8x32xf32>, vector<8x32xf32>, vector<8x8xf32> -> vector<8x8xf32>
    %cst_1 = arith.constant 0.000000e+00 : f32
    %2 = vector.broadcast %cst_1 : f32 to vector<8x8xf32>
    %3 = arith.cmpf ogt, %1, %2 : vector<8x8xf32>
    %cst_2 = arith.constant 2.000000e-01 : f32
    %4 = vector.broadcast %cst_2 : f32 to vector<8x8xf32>
    %5 = arith.mulf %4, %1 : vector<8x8xf32>
    %6 = arith.select %3, %1, %5 : vector<8x8xi1>, vector<8x8xf32>
    %cst_3 = arith.constant dense<0xFF800000> : vector<8xf32>
    %7 = vector.multi_reduction <maximumf>, %6, %cst_3 [1] : vector<8x8xf32> to vector<8xf32>
    %8 = vector.shape_cast %7 : vector<8xf32> to vector<8x1xf32>
    %9 = vector.broadcast %8 : vector<8x1xf32> to vector<8x8xf32>
    %10 = arith.subf %6, %9 : vector<8x8xf32>
    %11 = math.exp %10 : vector<8x8xf32>
    %cst_4 = arith.constant dense<0.000000e+00> : vector<8xf32>
    %12 = vector.multi_reduction <add>, %11, %cst_4 [1] : vector<8x8xf32> to vector<8xf32>
    %13 = vector.shape_cast %12 : vector<8xf32> to vector<8x1xf32>
    %14 = vector.broadcast %13 : vector<8x1xf32> to vector<8x8xf32>
    %15 = arith.divf %11, %14 : vector<8x8xf32>
    %16 = tpu.iota {dimensions = array<i32: 0>} : vector<8x8xi32>
    %17 = tpu.iota {dimensions = array<i32: 1>} : vector<8x8xi32>
    %18 = arith.cmpi eq, %16, %17 : vector<8x8xi32>
    %19 = arith.extui %18 : vector<8x8xi1> to vector<8x8xi32>
    %20 = arith.sitofp %19 : vector<8x8xi32> to vector<8x8xf32>
    %21 = arith.addf %15, %20 : vector<8x8xf32>
    %c0_5 = arith.constant 0 : index
    %22 = memref.load %arg1[%c0_5] : memref<4xf32, #tpu.memory_space<smem>>
    %23 = vector.broadcast %22 : f32 to vector<8x8xf32>
    %24 = arith.mulf %23, %20 : vector<8x8xf32>
    %cst_6 = arith.constant dense<0.000000e+00> : vector<8x8xf32>
    %25 = tpu.matmul %21, %20, %cst_6 {dimension_numbers = #tpu.dot_dimension_numbers<[1], [0], [0], [1], [0, 0, 1, 1], [], []>} : vector<8x8xf32>, vector<8x8xf32>, vector<8x8xf32> -> vector<8x8xf32>
    %c1 = arith.constant 1 : index
    %26 = memref.load %arg1[%c1] : memref<4xf32, #tpu.memory_space<smem>>
    %27 = vector.broadcast %26 : f32 to vector<8x8xf32>
    %28 = arith.mulf %27, %25 : vector<8x8xf32>
    %29 = arith.addf %24, %28 : vector<8x8xf32>
    %cst_7 = arith.constant dense<0.000000e+00> : vector<8x8xf32>
    %30 = tpu.matmul %21, %25, %cst_7 {dimension_numbers = #tpu.dot_dimension_numbers<[1], [0], [0], [1], [0, 0, 1, 1], [], []>} : vector<8x8xf32>, vector<8x8xf32>, vector<8x8xf32> -> vector<8x8xf32>
    %c2 = arith.constant 2 : index
    %31 = memref.load %arg1[%c2] : memref<4xf32, #tpu.memory_space<smem>>
    %32 = vector.broadcast %31 : f32 to vector<8x8xf32>
    %33 = arith.mulf %32, %30 : vector<8x8xf32>
    %34 = arith.addf %29, %33 : vector<8x8xf32>
    %cst_8 = arith.constant dense<0.000000e+00> : vector<8x8xf32>
    %35 = tpu.matmul %21, %30, %cst_8 {dimension_numbers = #tpu.dot_dimension_numbers<[1], [0], [0], [1], [0, 0, 1, 1], [], []>} : vector<8x8xf32>, vector<8x8xf32>, vector<8x8xf32> -> vector<8x8xf32>
    %c3 = arith.constant 3 : index
    %36 = memref.load %arg1[%c3] : memref<4xf32, #tpu.memory_space<smem>>
    %37 = vector.broadcast %36 : f32 to vector<8x8xf32>
    %38 = arith.mulf %37, %35 : vector<8x8xf32>
    %39 = arith.addf %34, %38 : vector<8x8xf32>
    %c0_9 = arith.constant 0 : index
    %c0_10 = arith.constant 0 : index
    %40 = vector.load %arg3[%c0_9, %c0_10] : memref<8x128xf32, #tpu.memory_space<vmem>>, vector<8x128xf32>
    %41 = arith.truncf %40 : vector<8x128xf32> to vector<8x128xbf16>
    %c0_11 = arith.constant 0 : index
    %c0_12 = arith.constant 0 : index
    %42 = vector.load %arg4[%c0_11, %c0_12] : memref<128x128xbf16, #tpu.memory_space<vmem>>, vector<128x128xbf16>
    %cst_13 = arith.constant dense<0.000000e+00> : vector<8x128xf32>
    %43 = tpu.matmul %41, %42, %cst_13 {dimension_numbers = #tpu.dot_dimension_numbers<[1], [0], [0], [1], [0, 0, 1, 1], [], []>} : vector<8x128xbf16>, vector<128x128xbf16>, vector<8x128xf32> -> vector<8x128xf32>
    %c0_14 = arith.constant 0 : index
    %c0_15 = arith.constant 0 : index
    %44 = vector.load %arg6[%c0_14, %c0_15] : memref<8x128xf32, #tpu.memory_space<vmem>>, vector<1x128xf32>
    %45 = vector.broadcast %44 : vector<1x128xf32> to vector<8x128xf32>
    %46 = arith.addf %43, %45 : vector<8x128xf32>
    %47 = arith.mulf %46, %46 : vector<8x128xf32>
    %48 = arith.truncf %47 : vector<8x128xf32> to vector<8x128xbf16>
    %c0_16 = arith.constant 0 : index
    %c0_17 = arith.constant 0 : index
    %49 = vector.load %arg5[%c0_16, %c0_17] : memref<128x128xbf16, #tpu.memory_space<vmem>>, vector<128x128xbf16>
    %cst_18 = arith.constant dense<0.000000e+00> : vector<8x128xf32>
    %50 = tpu.matmul %48, %49, %cst_18 {dimension_numbers = #tpu.dot_dimension_numbers<[1], [0], [0], [1], [0, 0, 1, 1], [], []>} : vector<8x128xbf16>, vector<128x128xbf16>, vector<8x128xf32> -> vector<8x128xf32>
    %cst_19 = arith.constant 9.99999974E-6 : f32
    %51 = vector.broadcast %cst_19 : f32 to vector<8x128xf32>
    %52 = arith.addf %50, %51 : vector<8x128xf32>
    %53 = math.rsqrt %52 : vector<8x128xf32>
    %54 = arith.mulf %46, %53 : vector<8x128xf32>
    %c1_20 = arith.constant 1 : index
    %c0_21 = arith.constant 0 : index
    %55 = vector.load %arg6[%c1_20, %c0_21] : memref<8x128xf32, #tpu.memory_space<vmem>>, vector<1x128xf32>
    %56 = vector.broadcast %55 : vector<1x128xf32> to vector<8x128xf32>
    %57 = arith.mulf %54, %56 : vector<8x128xf32>
    %c2_22 = arith.constant 2 : index
    %c0_23 = arith.constant 0 : index
    %58 = vector.load %arg6[%c2_22, %c0_23] : memref<8x128xf32, #tpu.memory_space<vmem>>, vector<1x128xf32>
    %59 = vector.broadcast %58 : vector<1x128xf32> to vector<8x128xf32>
    %60 = arith.addf %57, %59 : vector<8x128xf32>
    %61 = arith.truncf %39 : vector<8x8xf32> to vector<8x8xbf16>
    %62 = arith.truncf %60 : vector<8x128xf32> to vector<8x128xbf16>
    %cst_24 = arith.constant dense<0.000000e+00> : vector<8x128xf32>
    %63 = tpu.matmul %61, %62, %cst_24 {dimension_numbers = #tpu.dot_dimension_numbers<[1], [0], [0], [1], [0, 0, 1, 1], [], []>} : vector<8x8xbf16>, vector<8x128xbf16>, vector<8x128xf32> -> vector<8x128xf32>
    %cst_25 = arith.constant 0.000000e+00 : f32
    %64 = vector.broadcast %cst_25 : f32 to vector<8x128xf32>
    %65 = arith.maximumf %63, %64 : vector<8x128xf32>
    %66 = arith.addf %65, %40 : vector<8x128xf32>
    %c0_26 = arith.constant 0 : index
    %c0_27 = arith.constant 0 : index
    %67 = vector.load %arg7[%c0_26, %c0_27] : memref<8x128xf32, #tpu.memory_space<vmem>>, vector<8x128xf32>
    tpu.vector_store %arg7[%c0_26, %c0_27], %66 {strides = array<i32>} : memref<8x128xf32, #tpu.memory_space<vmem>>, vector<8x128xf32>,
    return
  }
  func.func @transform_0(%arg0: i32) -> i32 {
    %c0_i32 = arith.constant 0 : i32
    %c0_i32_0 = arith.constant 0 : i32
    return %c0_i32 : i32
  }
  func.func @transform_1(%arg0: i32) -> (i32, i32) {
    %c0_i32 = arith.constant 0 : i32
    %c0_i32_0 = arith.constant 0 : i32
    %c0_i32_1 = arith.constant 0 : i32
    return %c0_i32, %c0_i32_0 : i32, i32
  }
  func.func @transform_2(%arg0: i32) -> (i32, i32) {
    %c0_i32 = arith.constant 0 : i32
    %c0_i32_0 = arith.constant 0 : i32
    return %c0_i32, %arg0 : i32, i32
  }
  func.func @transform_3(%arg0: i32) -> (i32, i32) {
    %c0_i32 = arith.constant 0 : i32
    %c0_i32_0 = arith.constant 0 : i32
    %c0_i32_1 = arith.constant 0 : i32
    return %c0_i32, %c0_i32_0 : i32, i32
  }
  func.func @transform_4(%arg0: i32) -> (i32, i32) {
    %c0_i32 = arith.constant 0 : i32
    %c0_i32_0 = arith.constant 0 : i32
    %c0_i32_1 = arith.constant 0 : i32
    return %c0_i32, %c0_i32_0 : i32, i32
  }
  func.func @transform_5(%arg0: i32) -> (i32, i32) {
    %c0_i32 = arith.constant 0 : i32
    %c0_i32_0 = arith.constant 0 : i32
    %c0_i32_1 = arith.constant 0 : i32
    return %c0_i32, %c0_i32_0 : i32, i32
  }
  func.func @transform_6(%arg0: i32) -> (i32, i32) {
    %c0_i32 = arith.constant 0 : i32
    %c0_i32_0 = arith.constant 0 : i32
    return %c0_i32, %arg0 : i32, i32
  }
}

</mosaic_0001>

<bundles_post_ra>
// kernel: tpu_custom_call.1
= control target key start
LH: loop header
LB: loop body
LE: loop exit
PB: predicated region body
PF: predicated region fallthrough
CT: control target
= control target key end

     0   :  { %11 = vsyncpa [#allocation5], 0  ;;  %s1924_s0 = inlined_call_operand.hbm [shape: f32[4], index: 0, kind: input, shape index: {}]   ;;  %s1925_s1 = inlined_call_operand.hbm [shape: f32[8,32], index: 1, kind: input, shape index: {}]   ;;  %s1926_s2 = inlined_call_operand.hbm [shape: f32[8,256], index: 2, kind: input, shape index: {}]   ;;  %s1927_s3 = inlined_call_operand.hbm [shape: bf16[128,128], index: 3, kind: input, shape index: {}]   ;;  %s1928_s4 = inlined_call_operand.hbm [shape: bf16[128,128], index: 4, kind: input, shape index: {}]   ;;  %s1929_s5 = inlined_call_operand.vmem [shape: f32[8,128], index: 5, kind: input, shape index: {}]   ;;  %s1930_s6 = inlined_call_operand.hbm [shape: f32[8,256], index: 6, kind: output, shape index: {}]  }
   0x1   :  { %12 = vsyncpa [#allocation3], 0 }
   0x2   :  { %13 = vsyncpa [#allocation8], 0 }
   0x3   :  { %15 = vsyncpa [#allocation8 + $0x1], 0 }
   0x4   :  { %16 = vsyncpa [#allocation11], 0 }
   0x5   :  { %17 = vsyncpa [#allocation4], 0 }
   0x6   :  { %19 = vsyncpa [#allocation4 + $0x1], 0  ;;  %s1573_s21 = smov 0   ;;  %s1575_s22 = smov 0  }
   0x7   :  { %s1577_s23 = smov 0   ;;  %s1579_s24 = smov 0  }
   0x8 LB: > { %s1527_s25 = smov [#allocation9]   ;;  %s1594_s27 = sadd.s32 4294967295, %s1525_s24   ;;  %s1525_s24 = sphi %s1579_s24, %s1957_s24   ;;  %s1521_s23 = sphi %s1577_s23, %s1956_s23   ;;  %s1517_s22 = sphi %s1575_s22, %s1955_s22   ;;  %s1513_s21 = sphi %s1573_s21, %s1954_s21  }
   0x9   : > { %s219_s26 = sshll.u32 %s1527_s25, 4  ;;  %p1059_p0 = scmp.ge.s32.totalorder %s1525_s24, 1  ;;  %s1600_s26 = int_to_ptr.vmem [resolvable:$true] %s219_s26 }
   0xa   : > { %p1931_p1 = scmp.eq.s32.totalorder %s1594_s27, 0  ;;  %p174_p2 = scmp.eq.s32.totalorder %s1594_s27, 1 }
   0xb   : > { %p187_p3 = scmp.lt.s32.totalorder %s1525_s24, 3  ;;  %s1528_s29 = smov [#allocation6]  }
   0xc   : > { %s209_s30 = sshll.u32 %s1528_s29, 4  ;;  %s1529_s8 = smov [#allocation10]   ;;  %s1615_s30 = int_to_ptr.vmem [resolvable:$true] %s209_s30 }
   0xd   : > { %p1602_p4 = pnand %p1059_p0, %p187_p3  ;;  %s232_s9 = sshll.u32 %s1529_s8, 4  ;;  %s1617_s9 = int_to_ptr.vmem [resolvable:$true] %s232_s9 }
   0xe   : > { %s1316_s12 = scalar_lea.hbm %s1927_s3, 1024 }
   0xf   : > { %p1222_p6 = pneg %p1602_p4  ;;  %p1317_p8 = scmp.ne.s32.totalorder %s1927_s3, %s1316_s12 }
  0x10   : > { %p1323_p12 = scmp.lt.u32.totalorder %s1316_s12, %s1927_s3 }
  0x11   : > { %p1611_p7 = pnand %p1222_p6, %p1931_p1 }
  0x13   : > { %p1627_p9 = pneg %p1611_p7 }
  0x15   : > { %p1319_p10 = pnand %p1627_p9, %p1317_p8 }
  0x17   : > { %p1320_p11 = pneg %p1319_p10 }
  0x19   : > { %p1325_p13 = pnand %p1323_p12, %p1320_p11 }
  0x1b   : > { %1328 = shalt.err (!%p1325_p13)
}
  0x1c   : > { %s1329_s18 = scalar_lea.vmem %s1600_s26, 1024  ;;  %p1337_p5 = scmp.lt.s32.totalorder %s1600_s26, %s1600_s26 }
  0x1d   : > { %p1330_p0 = scmp.ne.s32.totalorder %s1600_s26, %s1329_s18  ;;  %p1338_p1 = scmp.lt.s32.totalorder %s1329_s18, %s1329_s18 }
  0x1f   : > { %p1332_p3 = pnand %p1330_p0, %p1627_p9  ;;  %p1339_p8 = por %p1338_p1, %p1337_p5 }
  0x21   : > { %p1333_p6 = pneg %p1332_p3 }
  0x23   : > { %p1340_p10 = pnand %p1339_p8, %p1333_p6 }
  0x25   : > { %1343 = shalt.err (!%p1340_p10)
}
  0x26   : > { %s1530_s19 = smov 64   ;;  %s1531_s20 = smov 4  }
  0x27   : > { %1231 = dma.hbm_to_vmem [thread:$0]  (!%p1611_p7), %s1927_s3, 1024, %s1600_s26, [#allocation8], %s1530_s19, %s1530_s19, %s1531_s20  }
  0x28   : > { %s1344_s11 = scalar_lea.hbm %s1924_s0, 16 }
  0x29   : > { %p1345_p1 = scmp.ne.s32.totalorder %s1924_s0, %s1344_s11  ;;  %p1351_p12 = scmp.lt.u32.totalorder %s1344_s11, %s1924_s0 }
  0x2b   : > { %p1347_p5 = pnand %p1345_p1, %p1627_p9 }
  0x2d   : > { %p1348_p11 = pneg %p1347_p5 }
  0x2f   : > { %p1353_p13 = pnand %p1351_p12, %p1348_p11 }
  0x31   : > { %1356 = shalt.err (!%p1353_p13)
}
  0x32   : > { %s1532_s17 = smov [#allocation2]   ;;  %s1357_s8 = scalar_lea.hbm %s1925_s1, 128 }
  0x33   : > { %1225 = dma.hbm_to_smem (!%p1611_p7), %s1924_s0, 16, %s1532_s17, [#allocation5]  }
  0x34   : > { %p1358_p0 = scmp.ne.s32.totalorder %s1925_s1, %s1357_s8  ;;  %p1364_p8 = scmp.lt.u32.totalorder %s1357_s8, %s1925_s1 }
  0x36   : > { %p1360_p3 = pnand %p1358_p0, %p1627_p9 }
  0x38   : > { %p1361_p6 = pneg %p1360_p3 }
  0x3a   : > { %p1366_p10 = pnand %p1364_p8, %p1361_p6 }
  0x3c   : > { %1369 = shalt.err (!%p1366_p10)
}
  0x3d   : > { %s1370_s14 = scalar_lea.vmem %s1615_s30, 128  ;;  %p1378_p12 = scmp.lt.s32.totalorder %s1615_s30, %s1615_s30 }
  0x3e   : > { %p1371_p1 = scmp.ne.s32.totalorder %s1615_s30, %s1370_s14  ;;  %p1379_p13 = scmp.lt.s32.totalorder %s1370_s14, %s1370_s14 }
  0x40   : > { %p1373_p5 = pnand %p1371_p1, %p1627_p9  ;;  %p1380_p0 = por %p1379_p13, %p1378_p12 }
  0x42   : > { %p1374_p11 = pneg %p1373_p5 }
  0x44   : > { %p1381_p3 = pnand %p1380_p0, %p1374_p11 }
  0x46   : > { %1384 = shalt.err (!%p1381_p3)
}
  0x47   : > { %1228 = dma.hbm_to_vmem [thread:$0]  (!%p1611_p7), %s1925_s1, 128, %s1615_s30, [#allocation3]  }
  0x48   : > { %s1385_s25 = scalar_lea.hbm %s1928_s4, 1024 }
  0x49   : > { %p1386_p6 = scmp.ne.s32.totalorder %s1928_s4, %s1385_s25  ;;  %p1392_p1 = scmp.lt.u32.totalorder %s1385_s25, %s1928_s4 }
  0x4b   : > { %p1388_p8 = pnand %p1386_p6, %p1627_p9 }
  0x4d   : > { %p1389_p10 = pneg %p1388_p8 }
  0x4f   : > { %p1394_p5 = pnand %p1392_p1, %p1389_p10 }
  0x51   : > { %1397 = shalt.err (!%p1394_p5)
}
  0x52   : > { %s1398_s30 = scalar_lea.vmem %s1617_s9, 1024  ;;  %p1406_p0 = scmp.lt.s32.totalorder %s1617_s9, %s1617_s9 }
  0x53   : > { %p1399_p11 = scmp.ne.s32.totalorder %s1617_s9, %s1398_s30  ;;  %p1407_p3 = scmp.lt.s32.totalorder %s1398_s30, %s1398_s30 }
  0x55   : > { %p1401_p12 = pnand %p1399_p11, %p1627_p9  ;;  %p1408_p6 = por %p1407_p3, %p1406_p0 }
  0x57   : > { %p1402_p13 = pneg %p1401_p12 }
  0x59   : > { %p1409_p8 = pnand %p1408_p6, %p1402_p13 }
  0x5b   : > { %1412 = shalt.err (!%p1409_p8)
}
  0x5c   : > { %1234 = dma.hbm_to_vmem [thread:$0]  (!%p1611_p7), %s1928_s4, 1024, %s1617_s9, [#allocation11], %s1530_s19, %s1530_s19, %s1531_s20  }
  0x5d   : > { %s1058_s7 = sadd.s32 4294967294, %s1525_s24   ;;  %s1718_s15 = sadd.s32 1, %s1525_s24  }
  0x5e   : > { %s74_s14 = sadd.s32 1, %s1521_s23  ;;  %s71_s16 = ssub.s32 %s1525_s24, %s1718_s15 }
  0x5f   : > { %p81_p9 = scmp.ne.s32.totalorder %s1521_s23, %s1517_s22  ;;  %p72_p10 = scmp.eq.s32.totalorder %s71_s16, 0 }
  0x60   : > { %p82_p1 = scmp.eq.s32.totalorder %s1525_s24, 0  ;;  %p87_p5 = scmp.ne.s32.totalorder %s1517_s22, %s1513_s21 }
  0x61   : > { %p1730_p11 = por %p174_p2, %p81_p9  ;;  %p1938_p12 = scmp.eq.s32.totalorder %s1594_s27, 0 }
  0x62   : > { %s1735_s26 = scalar_select %p72_p10, %s1521_s23, %s74_s14  }
  0x63   : > { %s1937_s17 = scalar_select %p1730_p11, 1, 0 }
  0x64   : > { %p83_p7 = por %p82_p1, %p81_p9  ;;  %p1739_p13 = por %p1938_p12, %p87_p5 }
  0x65   : > { %p180_p0 = scmp.eq.s32.totalorder %s1058_s7, 1  ;;  %p1247_p3 = scmp.lt.s32.totalorder %s1525_s24, 2 }
  0x66   : > { %s1939_s9 = scalar_select %p1739_p13, 1, 0 }
  0x67   : > { %s249_s19 = sand.u32 1, %s1525_s24   ;;  %s251_s20 = sand.u32 1, %s1521_s23  }
  0x68   : > { %p1746_p6 = por %p180_p0, %p87_p5  ;;  %s1065_s25 = sshll.u32 %s251_s20, 3 }
  0x69   : > { %s1066_s29 = sshll.u32 %s1525_s24, 7  ;;  %s253_s30 = scalar_lea.vmem [#allocation7], %s1065_s25 }
  0x6a   : > { %s1940_s18 = scalar_select %p1746_p6, 1, 0 }
  0x6b   : > { %s1754_s12 = scalar_lea.hbm %s1926_s2, %s1066_s29  ;;  %s260_s11 = sshll.u32 %s253_s30, 4  ;;  %s1760_s11 = int_to_ptr.vmem [resolvable:$true] %s260_s11 }
  0x6c   : > { %p1756_p2 = pnand %p1247_p3, %p83_p7  ;;  %s250_s7 = scalar_lea.sflag [#allocation8], %s249_s19 }
  0x6d   : > { %s1413_s14 = scalar_lea.hbm %s1754_s12, 128  ;;  %s1418_s25 = scalar_lea.hbm %s1926_s2, 256 }
  0x6e   : > { %p1414_p8 = scmp.ne.s32.totalorder %s1754_s12, %s1413_s14  ;;  %p1415_p9 = pneg %p1756_p2 }
  0x6f   : > { %p1419_p5 = scmp.lt.u32.totalorder %s1754_s12, %s1926_s2  ;;  %p1420_p7 = scmp.lt.u32.totalorder %s1418_s25, %s1413_s14 }
  0x70   : > { %p1416_p10 = pnand %p1415_p9, %p1414_p8  ;;  %p1422_p0 = scmp.lt.u32.totalorder %s1413_s14, %s1754_s12 }
  0x71   : > { %p1421_p12 = por %p1420_p7, %p1419_p5 }
  0x72   : > { %p1417_p1 = pneg %p1416_p10 }
  0x73   : > { %p1423_p3 = por %p1422_p0, %p1421_p12 }
  0x75   : > { %p1424_p6 = pnand %p1423_p3, %p1417_p1 }
  0x77   : > { %1427 = shalt.err (!%p1424_p6)
}
  0x78   : > { %s1428_s19 = scalar_lea.vmem %s1760_s11, 128  ;;  %s1533_s10 = smov [#allocation7]  }
  0x79   : > { %p1429_p8 = scmp.ne.s32.totalorder %s1760_s11, %s1428_s19  ;;  %s1433_s30 = sshll.u32 %s1533_s10, 4  ;;  %s1434_s30 = int_to_ptr.vmem [resolvable:$false] %s1433_s30 }
  0x7a   : > { %s1435_s16 = scalar_lea.vmem %s1434_s30, 256  ;;  %p1436_p13 = scmp.lt.s32.totalorder %s1760_s11, %s1434_s30 }
  0x7b   : > { %p1431_p10 = pnand %p1429_p8, %p1415_p9  ;;  %p1437_p5 = scmp.lt.s32.totalorder %s1435_s16, %s1428_s19 }
  0x7d   : > { %p1432_p11 = pneg %p1431_p10  ;;  %p1438_p7 = por %p1437_p5, %p1436_p13 }
  0x7f   : > { %p1439_p12 = pnand %p1438_p7, %p1432_p11 }
  0x81   : > { %1442 = shalt.err (!%p1439_p12)
}
  0x82   : > { %1238 = dma.hbm_to_vmem [thread:$0]  (!%p1756_p2), %s1754_s12, 128, %s1760_s11, %s250_s7  }
  0x83   : > { %269 = sbr.rel (%p1602_p4) target bundleno = 1622 (0x656), region = 44  ;;  %p1942_p6 = scmp.eq.s32.totalorder (!%p1602_p4), %s1594_s27, 0 }
  0x8a   : > { %1488 = dma.done.wait (%p1942_p6), [#allocation5], 16   ;;  %p1943_p9 = pmov %p1942_p6 }
  0x8b   : > { %p1944_p1 = pmov %p1942_p6 }
  0x8c   : > { %1490 = vsyncadd (%p1943_p9), [#allocation5], 4294967280 }
  0x8d   : > { %1492 = dma.done.wait (%p1944_p1), [#allocation3], 128   ;;  %p1945_p11 = pmov %p1944_p1 }
  0x8e   : > { %s279_s12 = sand.u32 1, %s1594_s27   ;;  %s281_s11 = sand.u32 1, %s1517_s22  }
  0x8f   : > { %1494 = vsyncadd (%p1945_p11), [#allocation3], 4294967168  ;;  %s1801_s28 = sshll.u32 %s281_s11, 3  ;;  %s280_s13 = scalar_lea.sflag [#allocation8], %s279_s12 }
  0x90   : > { %s283_s7 = scalar_lea.vmem [#allocation7], %s1801_s28  ;;  %p1946_p4 = scmp.ne.s32.totalorder %s1939_s9, 0 }
  0x92   : > { %1496 = dma.done.wait (%p1946_p4), %s280_s13, 128  }
  0x93   : > { %1498 = vsyncadd (%p1946_p4), %s280_s13, 4294967168  ;;  %p1947_p13 = pmov %p1944_p1 }
  0x94   : > { %p1948_p2 = pmov %p1944_p1 }
  0x95   : > { %1500 = dma.done.wait (%p1947_p13), [#allocation8], 1024  }
  0x96   : > { %1502 = vsyncadd (%p1948_p2), [#allocation8], 4294966272  ;;  %p1949_p0 = pmov %p1944_p1 }
  0x98   : > { %1504 = dma.done.wait (%p1949_p0), [#allocation11], 1024   ;;  %p1950_p3 = pmov %p1949_p0 }
  0x9a   : > { %1506 = vsyncadd (%p1950_p3), [#allocation11], 4294966272 }
  0x9b   : > { %296 = sfence }
  0x9c   : > { %v322_v0 = vld [vmem:[#allocation6] sm:$0xff]  ;;  %vm323_vm0 = vcmask 261120   ;;  %v1534_v1 = vmov 0.0   ;;  %vm1535_vm1 = vmmov 0   ;;  %vm400_vm3 = vcmask 64512   ;;  %v1294_v21 = vld [vmem:[#allocation9] sm:$0xff]  }
  0x9d   : > { %1136 = vmatprep.subr.mxu0 %v1534_v1  ;;  %1138 = vmatprep.mubr.msk.f32.mxu0 %vm1535_vm1, %v1534_v1  ;;  %v412_v12 = vlaneseq  ;;  %v1536_v15 = vmov 1.0   ;;  %v1295_v24 = vld [vmem:[#allocation9 + $0x8] sm:$0xff]   ;;  %v1296_v25 = vld [vmem:[#allocation9 + $0x10] sm:$0xff]   ;;  %v1297_v26 = vld [vmem:[#allocation9 + $0x18] sm:$0xff]   ;;  %s420_s9 = sld [smem:[#allocation2]]  ;;  %s1079_s14 = sld [smem:[#allocation2 + $0x1]] }
  0x9e   : > { %1137 = vmatpush3.xpose.msk.msra.mxu0 %vm323_vm0, %v322_v0  ;;  %1146 = vmatprep.subr.mxu1 %v1534_v1  ;;  %v1298_v27 = vld [vmem:[#allocation9 + $0x20] sm:$0xff]   ;;  %v1299_v28 = vld [vmem:[#allocation9 + $0x28] sm:$0xff]   ;;  %v1300_v29 = vld [vmem:[#allocation9 + $0x30] sm:$0xff]   ;;  %s1081_s20 = sld [smem:[#allocation2 + $0x2]]  ;;  %s1083_s8 = sld [smem:[#allocation2 + $0x3]]  ;;  %vm884_vm5 = vcmask 1043456  }
  0x9f   : > { %1141 = vmatprep.subr.mxu0 %v1534_v1  ;;  %1148 = vmatprep.mubr.msk.f32.mxu1 %vm1535_vm1, %v1534_v1  ;;  %v413_v13 = vshrl.u32 %v412_v12, 7  ;;  %v415_v14 = vand.u32 127, %v412_v12  ;;  %v1301_v30 = vld [vmem:[#allocation9 + $0x38] sm:$0xff]   ;;  %v1302_v38 = vld [vmem:[#allocation10] sm:$0xff]   ;;  %v1303_v44 = vld [vmem:[#allocation10 + $0x8] sm:$0xff]   ;;  %s1105_s12 = sshll.u32 %s1594_s27, 7 }
  0xa0   : > { %v1844_v31 = vld [vmem:[%s283_s7] sm:$0xff]  ;;  %v1306_v47 = vld [vmem:[#allocation10 + $0x20] sm:$0xff]   ;;  %v1307_v48 = vld [vmem:[#allocation10 + $0x28] sm:$0xff]   ;;  %s320_s13 = scalar_lea.vmem [#allocation12], %s1801_s28  ;;  %s932_s27 = scalar_lea.sflag [#allocation4], %s281_s11 }
  0xa1   : > { %1139 = vmatmul.mubr.msk.f32.vlgmr.msra.gmra.mrb[0].mxu0 %vm323_vm0, %v322_v0  ;;  %vm416_vm4 = vcmp.eq.s32.totalorder %v413_v13, %v415_v14  ;;  %v649_v32 = vpack.c.bf16 %v1844_v31, %v1844_v31  ;;  %v1304_v45 = vld [vmem:[#allocation10 + $0x10] sm:$0xff]   ;;  %v1305_v46 = vld [vmem:[#allocation10 + $0x18] sm:$0xff]   ;;  %v1084_v51 = vld [vmem:[%s1929_s5] ss:$0 sm:$0xff]  ;;  %s945_s7 = sshll.u32 %s320_s13, 4  ;;  %p1951_p10 = scmp.ne.s32.totalorder %s1937_s17, 0  ;;  %s1881_s7 = int_to_ptr.vmem [resolvable:$true] %s945_s7 }
  0xa2   : > { %1143 = vmatprep.mubr.msk.f32.mxu0 %vm1535_vm1, %v1534_v1  ;;  %1142 = vmatpush3.msk.msra.mxu0 %vm416_vm4, %v1536_v15  ;;  %v1076_v18 = vsel %vm416_vm4, 1.0, %v1534_v1  ;;  %v1308_v49 = vld [vmem:[#allocation10 + $0x30] sm:$0xff]   ;;  %v1309_v50 = vld [vmem:[#allocation10 + $0x38] sm:$0xff]   ;;  %s1443_s28 = scalar_lea.vmem %s1881_s7, 128  ;;  %s1537_s25 = smov [#allocation12]  }
  0xa3   : > { %1151 = vmatprep.subr.mxu0 %v1534_v1  ;;  %v421_v33 = vstv %s420_s9  ;;  %v497_v34 = vstv %s1079_s14  ;;  %p1444_p8 = scmp.ne.s32.totalorder %s1881_s7, %s1443_s28  ;;  %s1447_s29 = sshll.u32 %s1537_s25, 4  ;;  %s1448_s29 = int_to_ptr.vmem [resolvable:$false] %s1447_s29 }
  0xa4   : > { %v422_v35 = vmul.f32 %v1076_v18, %v421_v33  ;;  %v571_v37 = vstv %s1081_s20  ;;  %v645_v59 = vstv %s1083_s8  ;;  %s1879_s20 = scalar_lea.hbm %s1930_s6, %s1105_s12  ;;  %s1449_s8 = scalar_lea.vmem %s1448_s29, 256 }
  0xa5   : > { %p1445_p5 = pnand %p1444_p8, %p1951_p10  ;;  %p1450_p12 = scmp.lt.s32.totalorder %s1881_s7, %s1448_s29 }
  0xa6   : > { %p1451_p6 = scmp.lt.s32.totalorder %s1449_s8, %s1443_s28 }
  0xa7   : > { %p1446_p7 = pneg %p1445_p5 }
  0xa8   : > { %p1452_p9 = por %p1451_p6, %p1450_p12 }
  0xaa   : > { %p1453_p1 = pnand %p1452_p9, %p1446_p7 }
 0x174   : > { %v393_v2 = vpop.f32.mrb[0].mxu0 }
 0x175   : > { %v398_v3 = vmul.f32 0.2, %v393_v2  ;;  %v1140_v4 = vpop.f32.mrb[1].mxu0  ;;  %vm397_vm2 = vcmp.gt.f32.partialorder %v393_v2, 0.0 }
 0x177   : > { %v399_v5 = vsel %vm397_vm2, %v393_v2, %v398_v3 }
 0x178   : > { %v401_v6 = vsel %vm400_vm3, %v399_v5, -inf }
 0x179   : > { %402 = vmax.xlane.f32.xlu0 %v401_v6  ;;  %v1101_v6 = vld [vmem:[%s1929_s5 + $0x1] ss:$0 sm:$0xff] }
 0x206   : > { %v403_v7 = vpop.xlane.xlu0 %402 }
 0x207   : > { %v404_v8 = vsub.f32 %v399_v5, %v403_v7 }
 0x209   : > { %v405_v9 = vmul.f32 1.442695, %v404_v8  ;;  %v1102_v8 = vld [vmem:[%s1929_s5 + $0x2] ss:$0 sm:$0xff] }
 0x20b   : > { %1310 = vpow2.f32 %v405_v9 }
 0x215   : > { %v1311_v10 = vpop.eup %1310 }
 0x216   : > { %v407_v11 = vsel %vm400_vm3, %v1311_v10, 0.0 }
 0x217   : > { %408 = vadd.xlane.f32.xlu0 %v407_v11 }
 0x2a4   : > { %v409_v16 = vpop.xlane.xlu0 %408 }
 0x2a5   : > { %1312 = vrcp.f32 %v409_v16 }
 0x2af   : > { %v1313_v17 = vpop.eup %1312 }
 0x2b0   : > { %v411_v19 = vmul.f32 %v1313_v17, %v1311_v10 }
 0x2b2   : > { %v419_v20 = vadd.f32 %v1076_v18, %v411_v19 }
 0x2b4   : > { %1144 = vmatmul.mubr.msk.f32.vlgmr.msra.gmra.mrb[2].mxu0 %vm400_vm3, %v419_v20 }
 0x2b5   : > { %1153 = vmatprep.mubr.msk.f32.mxu0 %vm1535_vm1, %v1534_v1 }
 0x387   : > { %v492_v22 = vpop.f32.mrb[2].mxu0 }
 0x388   : > { %v1145_v23 = vpop.f32.mrb[3].mxu0  ;;  %1147 = vmatpush3.msra.mxu1 %v492_v22  ;;  %v498_v36 = vmul.f32 %v497_v34, %v492_v22 }
 0x389   : > { %1149 = vmatmul.mubr.msk.f32.vlgmr.msra.gmra.mrb[0].mxu1 %vm400_vm3, %v419_v20  ;;  %1156 = vmatprep.subr.bf16.mxu1 %v1534_v1 }
 0x38a   : > { %1157 = vmatpush3.bf16.msra.mxu1 %v1294_v21  ;;  %1172 = vmatprep.mubr.msk.bf16.mxu1 %vm1535_vm1, %v1534_v1  ;;  %v499_v40 = vadd.f32 %v498_v36, %v422_v35 }
 0x38b   : > { %1158 = vmatprep.subr.bf16.mxu1 %v1534_v1 }
 0x38e   : > { %1159 = vmatpush3.bf16.msra.mxu1 %v1295_v24 }
 0x38f   : > { %1160 = vmatprep.subr.bf16.mxu1 %v1534_v1 }
 0x392   : > { %1161 = vmatpush3.bf16.msra.mxu1 %v1296_v25 }
 0x393   : > { %1162 = vmatprep.subr.bf16.mxu1 %v1534_v1 }
 0x396   : > { %1163 = vmatpush3.bf16.msra.mxu1 %v1297_v26 }
 0x397   : > { %1164 = vmatprep.subr.bf16.mxu1 %v1534_v1 }
 0x39a   : > { %1165 = vmatpush3.bf16.msra.mxu1 %v1298_v27 }
 0x39b   : > { %1166 = vmatprep.subr.bf16.mxu1 %v1534_v1 }
 0x39e   : > { %1167 = vmatpush3.bf16.msra.mxu1 %v1299_v28 }
 0x39f   : > { %1168 = vmatprep.subr.bf16.mxu1 %v1534_v1 }
 0x3a2   : > { %1169 = vmatpush3.bf16.msra.mxu1 %v1300_v29 }
 0x3a3   : > { %1170 = vmatprep.subr.bf16.mxu1 %v1534_v1 }
 0x3a6   : > { %1171 = vmatpush3.bf16.msra.mxu1 %v1301_v30 }
 0x3a7   : > { %1196 = vmatprep.subr.bf16.mxu1 %v1534_v1 }
 0x3a9   : > { %1173 = vmatmul.mubr.bf16.vlgmr.msra.gmra.mrb[4].mxu1 %v649_v32 }
 0x3aa   : > { %1198 = vmatprep.mubr.msk.bf16.mxu1 %vm1535_vm1, %v1534_v1 }
 0x45c   : > { %v566_v39 = vpop.f32.mrb[0].mxu1 }
 0x45d   : > { %v572_v41 = vmul.f32 %v571_v37, %v566_v39  ;;  %v1150_v42 = vpop.f32.mrb[1].mxu1  ;;  %1152 = vmatpush3.msra.mxu0 %v566_v39 }
 0x45e   : > { %1154 = vmatmul.mubr.msk.f32.vlgmr.msra.gmra.mrb[4].mxu0 %vm400_vm3, %v419_v20  ;;  %1176 = vmatprep.subr.bf16.mxu0 %v1534_v1 }
 0x45f   : > { %v573_v43 = vadd.f32 %v572_v41, %v499_v40  ;;  %1177 = vmatpush3.bf16.msra.mxu0 %v1302_v38  ;;  %1192 = vmatprep.mubr.msk.bf16.mxu0 %vm1535_vm1, %v1534_v1 }
 0x460   : > { %1178 = vmatprep.subr.bf16.mxu0 %v1534_v1 }
 0x463   : > { %1179 = vmatpush3.bf16.msra.mxu0 %v1303_v44 }
 0x464   : > { %1180 = vmatprep.subr.bf16.mxu0 %v1534_v1 }
 0x467   : > { %1181 = vmatpush3.bf16.msra.mxu0 %v1304_v45 }
 0x468   : > { %1182 = vmatprep.subr.bf16.mxu0 %v1534_v1 }
 0x46b   : > { %1183 = vmatpush3.bf16.msra.mxu0 %v1305_v46 }
 0x46c   : > { %1184 = vmatprep.subr.bf16.mxu0 %v1534_v1 }
 0x46f   : > { %1185 = vmatpush3.bf16.msra.mxu0 %v1306_v47 }
 0x470   : > { %1186 = vmatprep.subr.bf16.mxu0 %v1534_v1 }
 0x473   : > { %1187 = vmatpush3.bf16.msra.mxu0 %v1307_v48 }
 0x474   : > { %1188 = vmatprep.subr.bf16.mxu0 %v1534_v1 }
 0x477   : > { %1189 = vmatpush3.bf16.msra.mxu0 %v1308_v49 }
 0x478   : > { %1190 = vmatprep.subr.bf16.mxu0 %v1534_v1 }
 0x47b   : > { %1191 = vmatpush3.bf16.msra.mxu0 %v1309_v50 }
 0x47c   : > { %v753_v52 = vpop.f32.mrb[4].mxu1 }
 0x47d   : > { %v754_v53 = vadd.f32 %v1084_v51, %v753_v52  ;;  %v1174_v54 = vpop.f32.mrb[5].mxu1 }
 0x47e   : > { %v756_v55 = vpop.f32.mrb[6].mxu1 }
 0x47f   : > { %v759_v56 = vmul.f32 %v754_v53, %v754_v53  ;;  %v1175_v57 = vpop.f32.mrb[7].mxu1 }
 0x481   : > { %v760_v58 = vpack.c.bf16 %v759_v56, %v759_v56 }
 0x483   : > { %1193 = vmatmul.mubr.bf16.vlgmr.msra.gmra.mrb[8].mxu0 %v760_v58 }
 0x531   : > { %v640_v60 = vpop.f32.mrb[4].mxu0 }
 0x532   : > { %v646_v61 = vmul.f32 %v645_v59, %v640_v60  ;;  %v1155_v62 = vpop.f32.mrb[5].mxu0 }
 0x534   : > { %v647_v63 = vadd.f32 %v646_v61, %v573_v43 }
 0x536   : > { %v879_v13 = vpack.c.bf16 %v647_v63, %v647_v63 }
 0x556   : > { %v859_v0 = vpop.f32.mrb[8].mxu0 }
 0x557   : > { %v860_v1 = vadd.f32 1e-05, %v859_v0  ;;  %v1194_v2 = vpop.f32.mrb[9].mxu0 }
 0x558   : > { %v862_v3 = vpop.f32.mrb[10].mxu0 }
 0x559   : > { %1314 = vrsqrt.f32 %v860_v1  ;;  %v1195_v4 = vpop.f32.mrb[11].mxu0 }
 0x563   : > { %v1315_v5 = vpop.eup %1314 }
 0x564   : > { %v866_v7 = vmul.f32 %v1315_v5, %v754_v53 }
 0x566   : > { %v872_v9 = vmul.f32 %v1101_v6, %v866_v7 }
 0x568   : > { %v878_v10 = vadd.f32 %v1102_v8, %v872_v9 }
 0x56a   : > { %v880_v11 = vpack.c.bf16 %v878_v10, %v878_v10 }
 0x56c   : > { %v886_v12 = vsel %vm884_vm5, %v880_v11, 0 }
 0x56d   : > { %1197 = vmatpush3.bf16.msra.mxu1 %v886_v12 }
 0x570   : > { %1199 = vmatmul.mubr.msk.bf16.vlgmr.msra.gmra.mrb[8].mxu1 %vm400_vm3, %v879_v13 }
 0x643   : > { %v922_v14 = vpop.f32.mrb[8].mxu1 }
 0x644   : > { %v928_v15 = vmax.f32 %v922_v14, 0.0  ;;  %v1200_v16 = vpop.f32.mrb[9].mxu1 }
 0x645   : > { %v925_v17 = vpop.f32.mrb[10].mxu1 }
 0x646   : > { %v929_v18 = vadd.f32 %v928_v15, %v1844_v31  ;;  %v1201_v19 = vpop.f32.mrb[11].mxu1 }
 0x648   : > { %930 = vst [vmem:[%s320_s13] sm:$0xff] %v929_v18 }
 0x649   : > { %1456 = shalt.err (!%p1453_p1)
}
 0x64a   : > { %s1457_s11 = scalar_lea.hbm %s1879_s20, 128  ;;  %s1461_s30 = scalar_lea.hbm %s1930_s6, 256 }
 0x64b   : > { %p1458_p11 = scmp.ne.s32.totalorder %s1879_s20, %s1457_s11  ;;  %p1462_p2 = scmp.lt.u32.totalorder %s1879_s20, %s1930_s6 }
 0x64c   : > { %p1463_p0 = scmp.lt.u32.totalorder %s1461_s30, %s1457_s11  ;;  %p1465_p8 = scmp.lt.u32.totalorder %s1457_s11, %s1879_s20 }
 0x64d   : > { %p1459_p4 = pnand %p1458_p11, %p1951_p10 }
 0x64e   : > { %p1464_p3 = por %p1463_p0, %p1462_p2 }
 0x64f   : > { %p1460_p13 = pneg %p1459_p4 }
 0x650   : > { %p1466_p5 = por %p1465_p8, %p1464_p3 }
 0x652   : > { %p1467_p7 = pnand %p1466_p5, %p1460_p13 }
 0x654   : > { %1470 = shalt.err (!%p1467_p7)
}
 0x655   : > { %1220 = dma.vmem_to_hbm [thread:$0]  (%p1951_p10), %s1881_s7, 128, %s1879_s20, %s932_s27  }
 0x656 PF: > { %s957_s13 = sand.u32 1, %s1513_s21   ;;  %p1952_p12 = scmp.ne.s32.totalorder %s1940_s18, 0 }
 0x657   : > { %p1953_p6 = scmp.ge.s32.totalorder %s1525_s24, 2  ;;  %s958_s9 = scalar_lea.sflag [#allocation4], %s957_s13 }
 0x659   : > { %p1240_p9 = pnand %p1953_p6, %p1952_p12 }
 0x65b   : > { %1508 = dma.done.wait (!%p1240_p9), %s958_s9, 128  }
 0x65c   : > { %1510 = vsyncadd (!%p1240_p9), %s958_s9, 4294967168  ;;  %p22_p1 = scmp.ge.s32.totalorder %s1718_s15, 4   ;;  %s1954_s21 = smov %s1517_s22 }
 0x65d   : > { %s1955_s22 = smov %s1521_s23  ;;  %s1956_s23 = smov %s1735_s26 }
 0x65e   : > { %s1957_s24 = smov %s1718_s15  ;;  %24 = sbr.rel (!%p22_p1) target bundleno = 8 (0x8), region = 107 }
 0x665   :  { %963 = vsyncpa [#allocation3], 1 }
 0x666   :  { %965 = vsyncpa [#allocation3 + $0x1], 1 }
 0x667   :  { %966 = vsyncpa [#allocation8], 1 }
 0x668   :  { %968 = vsyncpa [#allocation8 + $0x1], 1 }
 0x669   :  { %969 = vsyncpa [#allocation11], 1 }
 0x66a   :  { %970 = vsyncpa [#allocation4], 1 }
 0x66b   :  { %972 = vsyncpa [#allocation4 + $0x1], 1 }
 0x66c   :  { %973 = vsyncpa [#allocation5], 1 }
 0x66d   :  { %975 = vsyncpa [#allocation5 + $0x1], 1 }

</bundles_post_ra>
